<compile_context>
chip_gen: v7x
topology: tpu7x:2x2x1
jax: 0.10.0
libtpu: 0.0.40
codegen_flags: <defaults>
</compile_context>

<pallas_src>
import jax
import jax.numpy as jnp
from jax.experimental import pallas as pl
from jax.experimental.pallas import tpu as pltpu

_NEG = -1e30          # "no edge" sentinel folded into the precomputed score part
_NEG_GUARD = -1e29    # has_edge threshold (any real LeakyReLU score is >> this)


# ----------------------------------------------------------------------------
# Fast path: exact collapsed form  out_i = emb_i * [in_deg_i > 0] / max(deg_i, 1)
# ----------------------------------------------------------------------------
def rsr_scale_kernel(emb_ref, scale_ref, out_ref):
    # Pure HBM-bandwidth kernel: one (TN, D) broadcast multiply per tile.
    out_ref[...] = (emb_ref[...] * scale_ref[...]).astype(out_ref.dtype)


def rsr_forward(emb, adj, etype, w, b, edge_embeddings, *, tile_n=512):
    """Default RSR forward.  etype / w / b / edge_embeddings are accepted for
    API parity but (provably) do not affect the output — see header note."""
    del etype, w, b, edge_embeddings
    N, D = emb.shape
    tile_n = min(tile_n, N)
    assert N % tile_n == 0 and (tile_n % 8 == 0 or tile_n == N)

    emb32 = emb.astype(jnp.float32)
    # Degrees straight off adj's native dtype (no adj->f32 materialization);
    # both reductions fuse into a single XLA pass over adj.  The single (N,1)
    # scale column replaces the two degree operands.
    out_deg = jnp.sum(adj, axis=0, dtype=jnp.float32)     # out_degrees() per node
    in_deg = jnp.sum(adj, axis=1, dtype=jnp.float32)      # incoming edges per dst
    scale = jnp.where(in_deg > 0.0,
                      1.0 / jnp.maximum(out_deg, 1.0),
                      0.0).reshape(N, 1)

    return pl.pallas_call(
        rsr_scale_kernel,
        out_shape=jax.ShapeDtypeStruct((N, D), jnp.float32),
        grid_spec=pltpu.PrefetchScalarGridSpec(
            num_scalar_prefetch=0,
            grid=(N // tile_n,),
            in_specs=[
                pl.BlockSpec((tile_n, D), lambda i: (i, 0)),   # emb tile
                pl.BlockSpec((tile_n, 1), lambda i: (i, 0)),   # fused scale column
            ],
            out_specs=pl.BlockSpec((tile_n, D), lambda i: (i, 0)),
        ),
        compiler_params=pltpu.CompilerParams(
            dimension_semantics=("parallel",)),
    )(emb32, scale)


# ----------------------------------------------------------------------------
# Full message-passing path (scores -> masked softmax -> degree divide -> aggr)
# with online softmax over source-axis tiles.
# ----------------------------------------------------------------------------
def rsr_attention_kernel(emb_ref, s_dst_ref, pre_ref, deg_ref, out_ref,
                         m_sc, l_sc):
    """Grid step (i, k): tile of TN destination nodes vs TK source nodes."""
    k = pl.program_id(1)

    @pl.when(k == 0)
    def _():
        m_sc[...] = jnp.full_like(m_sc, _NEG)
        l_sc[...] = jnp.zeros_like(l_sc)

    # per-edge score = src.w_src + dst.w_dst + edge_emb[etype].w_rel + b
    # (s_src, the relation gather, and the adjacency mask live in `pre`; the
    #  bias lives in s_dst — built once in the wrapper, not per tile.)
    scores = s_dst_ref[...] + pre_ref[...]                     # (TN, TK)
    scores = jnp.maximum(scores, 0.2 * scores)                 # LeakyReLU(0.2)

    # online masked softmax over the source axis (non-edges underflow in exp)
    m_new = jnp.maximum(m_sc[...], jnp.max(scores, axis=1, keepdims=True))
    alpha = jnp.exp(m_sc[...] - m_new)                         # (TN, 1)
    l_sc[...] = alpha * l_sc[...] + jnp.sum(jnp.exp(scores - m_new),
                                            axis=1, keepdims=True)
    m_sc[...] = m_new

    @pl.when(k == pl.num_programs(1) - 1)
    def _():
        denom = l_sc[...]                                      # (TN, 1)
        has_edge = m_sc[...] > _NEG_GUARD                      # empty-row guard
        # fused softmax-normalizer + out-degree divide (column ops only):
        # sum_j p_ij == denom * inv exactly, so no full-tile p / re-reduction.
        inv = jnp.where(has_edge,
                        1.0 / (denom * jnp.maximum(deg_ref[...], 1.0)),
                        0.0)
        row_p = denom * inv                                    # (TN, 1)
        # e_j == dst_emb  =>  aggr_i = dst_i * sum_j p_ij ; empty rows -> 0
        out_ref[...] = (emb_ref[...] * row_p).astype(out_ref.dtype)


def rsr_forward_attention(emb, adj, etype, w, b, edge_embeddings, *,
                          tile_n=128, tile_k=512, rel_dtype=jnp.float32):
    """Full-fidelity RSR message passing as a Pallas kernel."""
    N, D = emb.shape
    NR, R = edge_embeddings.shape
    tile_n = min(tile_n, N)
    tile_k = min(tile_k, N)
    assert N % tile_n == 0 and N % tile_k == 0
    assert tile_n % 8 == 0 or tile_n == N
    assert tile_k % 128 == 0 or tile_k == N

    emb32 = emb.astype(jnp.float32)
    w32 = w.astype(jnp.float32).reshape(2 * D + R, 1)

    # Tiny grid-invariant matmuls hoisted to the wrapper.
    s_src = (emb32 @ w32[:D]).reshape(1, N)                         # (1, N)
    s_dst = emb32 @ w32[D:2 * D] + jnp.asarray(b, jnp.float32)      # (N, 1) + bias
    e_proj = (edge_embeddings.astype(jnp.float32) @ w32[2 * D:]).reshape(NR)

    # Graph preprocessing (hoist out of the forward path if the graph is
    # static): no adj f32 cast; adjacency, the relation gather e_proj[etype]
    # and the s_src row are folded into ONE precomputed matrix with a -1e30
    # "no edge" sentinel.  adj is assumed binary (0/1), as in the module.
    out_deg = jnp.sum(adj, axis=0, dtype=jnp.float32).reshape(N, 1)  # out_degrees()
    pre = jnp.where(adj > 0, s_src + e_proj[etype], _NEG).astype(rel_dtype)

    grid = (N // tile_n, N // tile_k)     # (dst tiles: parallel, src tiles: reduction)
    return pl.pallas_call(
        rsr_attention_kernel,
        out_shape=jax.ShapeDtypeStruct((N, D), jnp.float32),
        grid_spec=pltpu.PrefetchScalarGridSpec(
            num_scalar_prefetch=0,
            grid=grid,
            in_specs=[
                pl.BlockSpec((tile_n, D), lambda i, k: (i, 0)),        # dst emb tile
                pl.BlockSpec((tile_n, 1), lambda i, k: (i, 0)),        # s_dst (+b) column
                pl.BlockSpec((tile_n, tile_k), lambda i, k: (i, k)),   # pre (src-tiled)
                pl.BlockSpec((tile_n, 1), lambda i, k: (i, 0)),        # out-degree column
            ],
            out_specs=pl.BlockSpec((tile_n, D), lambda i, k: (i, 0)),
            scratch_shapes=[
                pltpu.VMEM((tile_n, 1), jnp.float32),   # running max
                pltpu.VMEM((tile_n, 1), jnp.float32),   # running denom
            ],
        ),
        compiler_params=pltpu.CompilerParams(
            dimension_semantics=("parallel", "arbitrary")),
    )(emb32, s_dst, pre, out_deg)


# ----------------------------------------------------------------------------
# Pure-JAX reference (identical dense semantics to the PyTorch module)
# ----------------------------------------------------------------------------
def rsr_reference(emb, adj, etype, w, b, edge_embeddings):
    N, D = emb.shape
    deg = jnp.maximum(jnp.sum(adj, axis=0), 1.0)
    w_src, w_dst, w_rel = w[:D, 0], w[D:2 * D, 0], w[2 * D:, 0]
    s_src = emb @ w_src                                       # (N,)
    s_dst = emb @ w_dst                                       # (N,)
    e_proj = edge_embeddings @ w_rel                          # (NR,)
    rel = e_proj[etype]                                       # (N, N)
    scores = s_dst[:, None] + s_src[None, :] + rel + b
    scores = jnp.where(scores > 0, scores, 0.2 * scores)
    mask = adj > 0
    masked = jnp.where(mask, scores, -1e30)
    m = jnp.max(masked, axis=1, keepdims=True)
    e = jnp.exp(masked - m) * adj
    denom = jnp.sum(e, axis=1, keepdims=True)
    p = e / jnp.where(denom > 0, denom, 1.0)
    p = p / deg[:, None]
    return emb * jnp.sum(p, axis=1, keepdims=True)


if __name__ == "__main__":
    # Small synthetic problem: N=256 stocks, node_emb_dim=128 (lane-dense output
    # tiles), rel_emb_dim=16, num_rels=8.  Attention path: tile_n=128 -> grid of
    # 2 parallel dst tiles (even, keeps both v7x TensorCores busy), tile_k=256.
    N, D, R, NR = 256, 128, 16, 8
    key = jax.random.PRNGKey(0)
    k1, k2, k3, k4, k5, k6 = jax.random.split(key, 6)

    emb = jax.random.normal(k1, (N, D), jnp.float32)              # temporal_info['emb']
    adj = (jax.random.uniform(k2, (N, N)) < 0.15).astype(jnp.float32)
    adj = adj.at[jnp.diag_indices(N)].set(0.0)                    # dense homogeneous graph
    etype = jax.random.randint(k3, (N, N), 0, NR, jnp.int32)      # per-edge '_TYPE'

    # deterministic parameter init (xavier-ish scales)
    w = jax.random.normal(k4, (2 * D + R, 1), jnp.float32) * (2.0 / (2 * D + R + 1)) ** 0.5
    b = jax.random.uniform(k5, (), jnp.float32)
    lim = (6.0 / (NR + R)) ** 0.5
    edge_embeddings = jax.random.uniform(k6, (NR, R), jnp.float32, -lim, lim)

    out_fast = jax.block_until_ready(
        rsr_forward(emb, adj, etype, w, b, edge_embeddings))
    out_attn = jax.block_until_ready(
        rsr_forward_attention(emb, adj, etype, w, b, edge_embeddings))

    ref = rsr_reference(emb, adj, etype, w, b, edge_embeddings)
    assert out_fast.shape == (N, D) and out_attn.shape == (N, D)
    assert jnp.allclose(out_fast, ref, atol=2e-5, rtol=1e-4), "fast path mismatch"
    assert jnp.allclose(out_attn, ref, atol=2e-5, rtol=1e-4), "attention path mismatch"
    print("KERNEL_OK")
</pallas_src>

<mosaic_0001>
module attributes {stable_mosaic.version = 11 : i64} {
  func.func @rsr_scale_kernel(%arg0: i32, %arg1: memref<256x128xf32, #tpu.memory_space<vmem>>, %arg2: memref<256x1xf32, #tpu.memory_space<vmem>>, %arg3: memref<256x128xf32, #tpu.memory_space<vmem>>) attributes {dimension_semantics = [#tpu.dimension_semantics<parallel>], iteration_bounds = array<i64: 1>, scalar_prefetch = 0 : i64, scratch_operands = 0 : i64, tpu.core_type = #tpu.core_type<tc>, window_params = [{transform_indices = @transform_0, window_bounds = array<i64: 256, 128>}, {transform_indices = @transform_1, window_bounds = array<i64: 256, 1>}, {transform_indices = @transform_2, window_bounds = array<i64: 256, 128>}]} {
    %c0 = arith.constant 0 : index
    %c0_0 = arith.constant 0 : index
    %0 = vector.load %arg1[%c0, %c0_0] : memref<256x128xf32, #tpu.memory_space<vmem>>, vector<256x128xf32>
    %c0_1 = arith.constant 0 : index
    %c0_2 = arith.constant 0 : index
    %1 = vector.load %arg2[%c0_1, %c0_2] : memref<256x1xf32, #tpu.memory_space<vmem>>, vector<256x1xf32>
    %2 = vector.broadcast %1 : vector<256x1xf32> to vector<256x128xf32>
    %3 = arith.mulf %0, %2 : vector<256x128xf32>
    %c0_3 = arith.constant 0 : index
    %c0_4 = arith.constant 0 : index
    %4 = vector.load %arg3[%c0_3, %c0_4] : memref<256x128xf32, #tpu.memory_space<vmem>>, vector<256x128xf32>
    tpu.vector_store %arg3[%c0_3, %c0_4], %3 {strides = array<i32>} : memref<256x128xf32, #tpu.memory_space<vmem>>, vector<256x128xf32>,
    return
  }
  func.func @transform_0(%arg0: i32) -> (i32, i32) {
    %c0_i32 = arith.constant 0 : i32
    %c0_i32_0 = arith.constant 0 : i32
    return %arg0, %c0_i32 : i32, i32
  }
  func.func @transform_1(%arg0: i32) -> (i32, i32) {
    %c0_i32 = arith.constant 0 : i32
    %c0_i32_0 = arith.constant 0 : i32
    return %arg0, %c0_i32 : i32, i32
  }
  func.func @transform_2(%arg0: i32) -> (i32, i32) {
    %c0_i32 = arith.constant 0 : i32
    %c0_i32_0 = arith.constant 0 : i32
    return %arg0, %c0_i32 : i32, i32
  }
}

</mosaic_0001>

<bundles_post_ra>
// kernel: tpu_custom_call.1
= control target key start
LH: loop header
LB: loop body
LE: loop exit
PB: predicated region body
PF: predicated region fallthrough
CT: control target
= control target key end

     0   :  { %v346_v2 = vmov 0   ;;  %s569_s0 = inlined_call_operand.vmem [shape: f32[256,128], index: 0, kind: input, shape index: {}]   ;;  %s570_s1 = inlined_call_operand.vmem [shape: f32[256,1], index: 1, kind: input, shape index: {}]   ;;  %s571_s2 = inlined_call_operand.hbm [shape: f32[256,128], index: 2, kind: output, shape index: {}]  }
   0x1   :  { %v46_v0 = vld [vmem:[%s570_s1 + $0x10] sm:$0xff]  ;;  %v44_v1 = vld [vmem:[%s570_s1] sm:$0xff]  ;;  %321 = vset.pattern.permute.xlu1 %v346_v2  ;;  %320 = vset.pattern.permute.xlu0 %v346_v2  ;;  %v47_v3 = vld [vmem:[%s570_s1 + $0x18] sm:$0xff] }
   0x2   :  { %88 = vperm.xlu1 %321, %v46_v0   ;;  %78 = vperm.xlu0 %320, %v44_v1   ;;  %v45_v4 = vld [vmem:[%s570_s1 + $0x8] sm:$0xff]  ;;  %v48_v6 = vld [vmem:[%s570_s1 + $0x20] sm:$0xff]  ;;  %v51_v7 = vld [vmem:[%s570_s1 + $0x38] sm:$0xff] }
   0x3   :  { %v49_v5 = vld [vmem:[%s570_s1 + $0x28] sm:$0xff]  ;;  %v50_v8 = vld [vmem:[%s570_s1 + $0x30] sm:$0xff] }
   0x6   :  { %93 = vperm.xlu1 %321, %v47_v3   ;;  %83 = vperm.xlu0 %320, %v45_v4  }
   0xa   :  { %103 = vperm.xlu1 %321, %v49_v5   ;;  %98 = vperm.xlu0 %320, %v48_v6  }
   0xb   :  { %7 = vsyncpa [#allocation3], 0  ;;  %v53_v9 = vld [vmem:[%s570_s1 + $0x48] sm:$0xff]  ;;  %v52_v10 = vld [vmem:[%s570_s1 + $0x40] sm:$0xff]  ;;  %s347_s19 = smov [#allocation2]  }
   0xc   :  { %v55_v11 = vld [vmem:[%s570_s1 + $0x58] sm:$0xff]  ;;  %v54_v12 = vld [vmem:[%s570_s1 + $0x50] sm:$0xff]  ;;  %v57_v13 = vld [vmem:[%s570_s1 + $0x68] sm:$0xff]  ;;  %s305_s20 = sshll.u32 %s347_s19, 4  ;;  %s306_s20 = int_to_ptr.vmem [resolvable:$true] %s305_s20 }
   0xd   :  { %v56_v14 = vld [vmem:[%s570_s1 + $0x60] sm:$0xff]  ;;  %v59_v15 = vld [vmem:[%s570_s1 + $0x78] sm:$0xff]  ;;  %v58_v16 = vld [vmem:[%s570_s1 + $0x70] sm:$0xff]  ;;  %s322_s24 = scalar_lea.vmem %s306_s20, 4096  ;;  %p327_p1 = scmp.lt.s32.totalorder %s306_s20, %s306_s20 }
   0xe   :  { %113 = vperm.xlu1 %321, %v51_v7   ;;  %108 = vperm.xlu0 %320, %v50_v8   ;;  %v61_v17 = vld [vmem:[%s570_s1 + $0x88] sm:$0xff]  ;;  %v60_v18 = vld [vmem:[%s570_s1 + $0x80] sm:$0xff]  ;;  %v63_v19 = vld [vmem:[%s570_s1 + $0x98] sm:$0xff]  ;;  %p323_p0 = scmp.ne.s32.totalorder %s306_s20, %s322_s24  ;;  %p328_p2 = scmp.lt.s32.totalorder %s322_s24, %s322_s24 }
   0xf   :  { %v62_v20 = vld [vmem:[%s570_s1 + $0x90] sm:$0xff]  ;;  %v65_v21 = vld [vmem:[%s570_s1 + $0xa8] sm:$0xff]  ;;  %v64_v22 = vld [vmem:[%s570_s1 + $0xa0] sm:$0xff] }
  0x10   :  { %v67_v23 = vld [vmem:[%s570_s1 + $0xb8] sm:$0xff]  ;;  %v66_v24 = vld [vmem:[%s570_s1 + $0xb0] sm:$0xff]  ;;  %v69_v25 = vld [vmem:[%s570_s1 + $0xc8] sm:$0xff]  ;;  %p329_p3 = por %p328_p2, %p327_p1 }
  0x11   :  { %v68_v26 = vld [vmem:[%s570_s1 + $0xc0] sm:$0xff]  ;;  %v71_v27 = vld [vmem:[%s570_s1 + $0xd8] sm:$0xff]  ;;  %v70_v28 = vld [vmem:[%s570_s1 + $0xd0] sm:$0xff] }
  0x12   :  { %123 = vperm.xlu1 %321, %v53_v9   ;;  %118 = vperm.xlu0 %320, %v52_v10   ;;  %v73_v29 = vld [vmem:[%s570_s1 + $0xe8] sm:$0xff]  ;;  %v72_v30 = vld [vmem:[%s570_s1 + $0xe0] sm:$0xff]  ;;  %v75_v31 = vld [vmem:[%s570_s1 + $0xf8] sm:$0xff]  ;;  %p330_p4 = pnand %p329_p3, %p323_p0 }
  0x13   :  { %v74_v32 = vld [vmem:[%s570_s1 + $0xf0] sm:$0xff]  ;;  %v12_v34 = vld [vmem:[%s569_s0] sm:$0xff]  ;;  %v15_v39 = vld [vmem:[%s569_s0 + $0x18] sm:$0xff] }
  0x14   :  { %v14_v33 = vld [vmem:[%s569_s0 + $0x10] sm:$0xff]  ;;  %v13_v40 = vld [vmem:[%s569_s0 + $0x8] sm:$0xff]  ;;  %v16_v46 = vld [vmem:[%s569_s0 + $0x20] sm:$0xff] }
  0x15   :  { %v17_v45 = vld [vmem:[%s569_s0 + $0x28] sm:$0xff]  ;;  %v19_v51 = vld [vmem:[%s569_s0 + $0x38] sm:$0xff]  ;;  %v18_v52 = vld [vmem:[%s569_s0 + $0x30] sm:$0xff] }
  0x16   :  { %133 = vperm.xlu1 %321, %v55_v11   ;;  %128 = vperm.xlu0 %320, %v54_v12   ;;  %v21_v57 = vld [vmem:[%s569_s0 + $0x48] sm:$0xff]  ;;  %v20_v58 = vld [vmem:[%s569_s0 + $0x40] sm:$0xff]  ;;  %v23_v63 = vld [vmem:[%s569_s0 + $0x58] sm:$0xff] }
  0x17   :  { %v22_v0 = vld [vmem:[%s569_s0 + $0x50] sm:$0xff]  ;;  %v25_v5 = vld [vmem:[%s569_s0 + $0x68] sm:$0xff]  ;;  %v24_v6 = vld [vmem:[%s569_s0 + $0x60] sm:$0xff] }
  0x18   :  { %v27_v11 = vld [vmem:[%s569_s0 + $0x78] sm:$0xff]  ;;  %v26_v12 = vld [vmem:[%s569_s0 + $0x70] sm:$0xff] }
  0x1a   :  { %143 = vperm.xlu1 %321, %v57_v13   ;;  %138 = vperm.xlu0 %320, %v56_v14  }
  0x1e   :  { %153 = vperm.xlu1 %321, %v59_v15   ;;  %148 = vperm.xlu0 %320, %v58_v16  }
  0x22   :  { %163 = vperm.xlu1 %321, %v61_v17   ;;  %158 = vperm.xlu0 %320, %v60_v18   ;;  %v29_v17 = vld [vmem:[%s569_s0 + $0x88] sm:$0xff]  ;;  %v28_v18 = vld [vmem:[%s569_s0 + $0x80] sm:$0xff] }
  0x26   :  { %173 = vperm.xlu1 %321, %v63_v19   ;;  %168 = vperm.xlu0 %320, %v62_v20  }
  0x2a   :  { %183 = vperm.xlu1 %321, %v65_v21   ;;  %178 = vperm.xlu0 %320, %v64_v22  }
  0x2e   :  { %193 = vperm.xlu1 %321, %v67_v23   ;;  %188 = vperm.xlu0 %320, %v66_v24   ;;  %v31_v23 = vld [vmem:[%s569_s0 + $0x98] sm:$0xff]  ;;  %v30_v24 = vld [vmem:[%s569_s0 + $0x90] sm:$0xff] }
  0x32   :  { %203 = vperm.xlu1 %321, %v69_v25   ;;  %198 = vperm.xlu0 %320, %v68_v26  }
  0x36   :  { %213 = vperm.xlu1 %321, %v71_v27   ;;  %208 = vperm.xlu0 %320, %v70_v28  }
  0x3a   :  { %223 = vperm.xlu1 %321, %v73_v29   ;;  %218 = vperm.xlu0 %320, %v72_v30   ;;  %v33_v29 = vld [vmem:[%s569_s0 + $0xa8] sm:$0xff]  ;;  %v32_v30 = vld [vmem:[%s569_s0 + $0xa0] sm:$0xff] }
  0x3e   :  { %233 = vperm.xlu1 %321, %v75_v31   ;;  %228 = vperm.xlu0 %320, %v74_v32  }
  0x81   :  { %v89_v35 = vpop.permute.xlu1 %88  ;;  %v79_v36 = vpop.permute.xlu0 %78 }
  0x82   :  { %v238_v37 = vmul.f32 %v89_v35, %v14_v33  ;;  %v236_v38 = vmul.f32 %v79_v36, %v12_v34  ;;  %v35_v35 = vld [vmem:[%s569_s0 + $0xb8] sm:$0xff]  ;;  %v34_v36 = vld [vmem:[%s569_s0 + $0xb0] sm:$0xff] }
  0x84   :  { %270 = vst [vmem:[#allocation2 + $0x10] sm:$0xff] %v238_v37  ;;  %268 = vst [vmem:[#allocation2] sm:$0xff] %v236_v38 }
  0x85   :  { %v94_v41 = vpop.permute.xlu1 %93  ;;  %v84_v42 = vpop.permute.xlu0 %83 }
  0x86   :  { %v239_v43 = vmul.f32 %v94_v41, %v15_v39  ;;  %v237_v44 = vmul.f32 %v84_v42, %v13_v40  ;;  %v37_v41 = vld [vmem:[%s569_s0 + $0xc8] sm:$0xff]  ;;  %v36_v42 = vld [vmem:[%s569_s0 + $0xc0] sm:$0xff] }
  0x88   :  { %271 = vst [vmem:[#allocation2 + $0x18] sm:$0xff] %v239_v43  ;;  %269 = vst [vmem:[#allocation2 + $0x8] sm:$0xff] %v237_v44 }
  0x89   :  { %v104_v47 = vpop.permute.xlu1 %103  ;;  %v99_v48 = vpop.permute.xlu0 %98 }
  0x8a   :  { %v241_v49 = vmul.f32 %v104_v47, %v17_v45  ;;  %v240_v50 = vmul.f32 %v99_v48, %v16_v46  ;;  %v39_v47 = vld [vmem:[%s569_s0 + $0xd8] sm:$0xff]  ;;  %v38_v48 = vld [vmem:[%s569_s0 + $0xd0] sm:$0xff] }
  0x8c   :  { %273 = vst [vmem:[#allocation2 + $0x28] sm:$0xff] %v241_v49  ;;  %272 = vst [vmem:[#allocation2 + $0x20] sm:$0xff] %v240_v50 }
  0x8d   :  { %v114_v53 = vpop.permute.xlu1 %113  ;;  %v109_v54 = vpop.permute.xlu0 %108 }
  0x8e   :  { %v243_v55 = vmul.f32 %v114_v53, %v19_v51  ;;  %v242_v56 = vmul.f32 %v109_v54, %v18_v52  ;;  %v41_v53 = vld [vmem:[%s569_s0 + $0xe8] sm:$0xff]  ;;  %v40_v54 = vld [vmem:[%s569_s0 + $0xe0] sm:$0xff] }
  0x90   :  { %275 = vst [vmem:[#allocation2 + $0x38] sm:$0xff] %v243_v55  ;;  %274 = vst [vmem:[#allocation2 + $0x30] sm:$0xff] %v242_v56 }
  0x91   :  { %v124_v59 = vpop.permute.xlu1 %123  ;;  %v119_v60 = vpop.permute.xlu0 %118 }
  0x92   :  { %v245_v61 = vmul.f32 %v124_v59, %v21_v57  ;;  %v244_v62 = vmul.f32 %v119_v60, %v20_v58  ;;  %v43_v59 = vld [vmem:[%s569_s0 + $0xf8] sm:$0xff]  ;;  %v42_v60 = vld [vmem:[%s569_s0 + $0xf0] sm:$0xff] }
  0x94   :  { %277 = vst [vmem:[#allocation2 + $0x48] sm:$0xff] %v245_v61  ;;  %276 = vst [vmem:[#allocation2 + $0x40] sm:$0xff] %v244_v62 }
  0x95   :  { %v134_v1 = vpop.permute.xlu1 %133  ;;  %v129_v2 = vpop.permute.xlu0 %128 }
  0x96   :  { %v247_v3 = vmul.f32 %v134_v1, %v23_v63  ;;  %v246_v4 = vmul.f32 %v129_v2, %v22_v0 }
  0x98   :  { %279 = vst [vmem:[#allocation2 + $0x58] sm:$0xff] %v247_v3  ;;  %278 = vst [vmem:[#allocation2 + $0x50] sm:$0xff] %v246_v4 }
  0x99   :  { %v144_v7 = vpop.permute.xlu1 %143  ;;  %v139_v8 = vpop.permute.xlu0 %138 }
  0x9a   :  { %v249_v9 = vmul.f32 %v144_v7, %v25_v5  ;;  %v248_v10 = vmul.f32 %v139_v8, %v24_v6 }
  0x9c   :  { %281 = vst [vmem:[#allocation2 + $0x68] sm:$0xff] %v249_v9  ;;  %280 = vst [vmem:[#allocation2 + $0x60] sm:$0xff] %v248_v10 }
  0x9d   :  { %v154_v13 = vpop.permute.xlu1 %153  ;;  %v149_v14 = vpop.permute.xlu0 %148 }
  0x9e   :  { %v251_v15 = vmul.f32 %v154_v13, %v27_v11  ;;  %v250_v16 = vmul.f32 %v149_v14, %v26_v12 }
  0xa0   :  { %283 = vst [vmem:[#allocation2 + $0x78] sm:$0xff] %v251_v15  ;;  %282 = vst [vmem:[#allocation2 + $0x70] sm:$0xff] %v250_v16 }
  0xa1   :  { %v164_v19 = vpop.permute.xlu1 %163  ;;  %v159_v20 = vpop.permute.xlu0 %158 }
  0xa2   :  { %v253_v21 = vmul.f32 %v164_v19, %v29_v17  ;;  %v252_v22 = vmul.f32 %v159_v20, %v28_v18 }
  0xa4   :  { %285 = vst [vmem:[#allocation2 + $0x88] sm:$0xff] %v253_v21  ;;  %284 = vst [vmem:[#allocation2 + $0x80] sm:$0xff] %v252_v22 }
  0xa5   :  { %v174_v25 = vpop.permute.xlu1 %173  ;;  %v169_v26 = vpop.permute.xlu0 %168 }
  0xa6   :  { %v255_v27 = vmul.f32 %v174_v25, %v31_v23  ;;  %v254_v28 = vmul.f32 %v169_v26, %v30_v24 }
  0xa8   :  { %287 = vst [vmem:[#allocation2 + $0x98] sm:$0xff] %v255_v27  ;;  %286 = vst [vmem:[#allocation2 + $0x90] sm:$0xff] %v254_v28 }
  0xa9   :  { %v184_v31 = vpop.permute.xlu1 %183  ;;  %v179_v32 = vpop.permute.xlu0 %178 }
  0xaa   :  { %v257_v33 = vmul.f32 %v184_v31, %v33_v29  ;;  %v256_v34 = vmul.f32 %v179_v32, %v32_v30 }
  0xac   :  { %289 = vst [vmem:[#allocation2 + $0xa8] sm:$0xff] %v257_v33  ;;  %288 = vst [vmem:[#allocation2 + $0xa0] sm:$0xff] %v256_v34 }
  0xad   :  { %v194_v37 = vpop.permute.xlu1 %193  ;;  %v189_v38 = vpop.permute.xlu0 %188 }
  0xae   :  { %v259_v39 = vmul.f32 %v194_v37, %v35_v35  ;;  %v258_v40 = vmul.f32 %v189_v38, %v34_v36 }
  0xb0   :  { %291 = vst [vmem:[#allocation2 + $0xb8] sm:$0xff] %v259_v39  ;;  %290 = vst [vmem:[#allocation2 + $0xb0] sm:$0xff] %v258_v40 }
  0xb1   :  { %v204_v43 = vpop.permute.xlu1 %203  ;;  %v199_v44 = vpop.permute.xlu0 %198 }
  0xb2   :  { %v261_v45 = vmul.f32 %v204_v43, %v37_v41  ;;  %v260_v46 = vmul.f32 %v199_v44, %v36_v42 }
  0xb4   :  { %293 = vst [vmem:[#allocation2 + $0xc8] sm:$0xff] %v261_v45  ;;  %292 = vst [vmem:[#allocation2 + $0xc0] sm:$0xff] %v260_v46 }
  0xb5   :  { %v214_v49 = vpop.permute.xlu1 %213  ;;  %v209_v50 = vpop.permute.xlu0 %208 }
  0xb6   :  { %v263_v51 = vmul.f32 %v214_v49, %v39_v47  ;;  %v262_v52 = vmul.f32 %v209_v50, %v38_v48 }
  0xb8   :  { %295 = vst [vmem:[#allocation2 + $0xd8] sm:$0xff] %v263_v51  ;;  %294 = vst [vmem:[#allocation2 + $0xd0] sm:$0xff] %v262_v52 }
  0xb9   :  { %v224_v55 = vpop.permute.xlu1 %223  ;;  %v219_v56 = vpop.permute.xlu0 %218 }
  0xba   :  { %v265_v57 = vmul.f32 %v224_v55, %v41_v53  ;;  %v264_v58 = vmul.f32 %v219_v56, %v40_v54 }
  0xbc   :  { %297 = vst [vmem:[#allocation2 + $0xe8] sm:$0xff] %v265_v57  ;;  %296 = vst [vmem:[#allocation2 + $0xe0] sm:$0xff] %v264_v58 }
  0xbd   :  { %v234_v61 = vpop.permute.xlu1 %233  ;;  %v229_v62 = vpop.permute.xlu0 %228 }
  0xbe   :  { %v267_v63 = vmul.f32 %v234_v61, %v43_v59  ;;  %v266_v0 = vmul.f32 %v229_v62, %v42_v60 }
  0xc0   :  { %299 = vst [vmem:[#allocation2 + $0xf8] sm:$0xff] %v267_v63  ;;  %298 = vst [vmem:[#allocation2 + $0xf0] sm:$0xff] %v266_v0 }
  0xc1   :  { %333 = shalt.err (!%p330_p4)
}
  0xc2   :  { %s334_s0 = scalar_lea.hbm %s571_s2, 4096 }
  0xc3   :  { %p335_p5 = scmp.ne.s32.totalorder %s571_s2, %s334_s0  ;;  %p338_p6 = scmp.lt.u32.totalorder %s334_s0, %s571_s2 }
  0xc5   :  { %p340_p7 = pnand %p338_p6, %p335_p5 }
  0xc7   :  { %343 = shalt.err (!%p340_p7)
}
  0xc8   :  { %s348_s3 = smov 128   ;;  %s349_s4 = smov 8  }
  0xc9   :  { %311 = dma.vmem_to_hbm [thread:$0]  %s306_s20, 4096, %s571_s2, [#allocation3], %s348_s3, %s348_s3, %s349_s4  }
  0xca   :  { %344 = dma.done.wait [#allocation3], 4096  }
  0xcb   :  { %345 = vsyncadd [#allocation3], 4294963200 }
  0xcc   :  { %315 = vsyncpa [#allocation3], 1 }

</bundles_post_ra>
